<compile_context>
chip_gen: v7x
topology: tpu7x:2x2x1
jax: 0.10.0
libtpu: 0.0.40
codegen_flags: <defaults>
</compile_context>

<pallas_src>
import jax
import jax.numpy as jnp
from jax.experimental import pallas as pl
from jax.experimental.pallas import tpu as pltpu


# ----------------------------------------------------------------------------
# Kernels
# ----------------------------------------------------------------------------
def _avgpool3x3_s1_kernel(x_ref, o_ref, pad_ref):
    # stride == 1 path: separable 3x3 sum over a zero-padded VMEM scratch.
    # x_ref: (tc, H, W), o_ref: (tc, H, W), pad_ref: (tc, H+2, W+2) scratch.
    tc, H, W = x_ref.shape
    dt = pad_ref.dtype

    # padding=1: zero ONLY the 1-element borders (not the whole scratch),
    # every grid step (scratch is per-TensorCore on v7x megacore).
    pad_ref[:, 0:1, :] = jnp.zeros((tc, 1, W + 2), dt)
    pad_ref[:, H + 1:H + 2, :] = jnp.zeros((tc, 1, W + 2), dt)
    pad_ref[:, :, 0:1] = jnp.zeros((tc, H + 2, 1), dt)
    pad_ref[:, :, W + 1:W + 2] = jnp.zeros((tc, H + 2, 1), dt)

    # Interior = input block (kept in its compute dtype: bf16 stays bf16).
    pad_ref[:, 1:H + 1, 1:W + 1] = x_ref[...].astype(dt)

    # 3-tap sum along W (lanes), then along H (sublanes): 6 adds, not 9.
    xp = pad_ref[...]
    row = xp[:, :, 0:W] + xp[:, :, 1:W + 1] + xp[:, :, 2:W + 2]      # (tc, H+2, W)
    s = row[:, 0:H, :] + row[:, 1:H + 1, :] + row[:, 2:H + 2, :]     # (tc, H, W)

    o_ref[...] = (s.astype(jnp.float32) * (1.0 / 9.0)).astype(o_ref.dtype)


def _avgpool3x3_strided_kernel(ah_ref, aw_ref, x_ref, o_ref):
    # stride > 1 path: out[c] = (Ah @ x[c] @ Aw^T) / 9 with banded 0/1 matrices
    # (3 ones per column; taps falling outside the image are absent, which is
    # identical to zero padding because the divisor is fixed at 9).  The
    # stride subsample is folded into the band matrices, so no strided
    # slices/gathers are needed -- only dense MXU matmuls.
    tc, H, W = x_ref.shape
    _, Ho, Wo = o_ref.shape
    x = x_ref[...].astype(jnp.float32)      # (tc, H, W)
    ah_t = ah_ref[...]                      # (H, Ho) == Ah^T
    aw_t = aw_ref[...]                      # (W, Wo) == Aw^T

    # Contract W (lane dim): (tc*H, W) @ (W, Wo).  HIGHEST keeps f32
    # activations exact to well under the 1e-4 tolerance.
    t = jnp.dot(x.reshape(tc * H, W), aw_t,
                precision=jax.lax.Precision.HIGHEST,
                preferred_element_type=jnp.float32)
    # Contract H: (tc*Wo, H) @ (H, Ho).
    t = jnp.swapaxes(t.reshape(tc, H, Wo), 1, 2).reshape(tc * Wo, H)
    u = jnp.dot(t, ah_t,
                precision=jax.lax.Precision.HIGHEST,
                preferred_element_type=jnp.float32)
    u = jnp.swapaxes(u.reshape(tc, Wo, Ho), 1, 2)                    # (tc, Ho, Wo)
    o_ref[...] = (u * (1.0 / 9.0)).astype(o_ref.dtype)


# ----------------------------------------------------------------------------
# Wrapper helpers
# ----------------------------------------------------------------------------
def _band_matrix_t(in_len, out_len, stride):
    # (in_len, out_len); [j, i] = 1 iff input index j is one of the 3 taps of
    # output index i (window centered at i*stride; out-of-range taps dropped).
    j = jnp.arange(in_len)[:, None]
    centers = (jnp.arange(out_len) * stride)[None, :]
    return (jnp.abs(j - centers) <= 1).astype(jnp.float32)


def _vmem_params():
    # (per-step block budget, scoped vmem_limit_bytes), branched on generation.
    phys = 128 << 20
    try:
        info = pltpu.get_tpu_info()
        phys = int(getattr(info, "vmem_capacity_bytes", phys))
    except Exception:
        pass
    if phys >= (100 << 20):            # v5e / v6e: 128 MiB physical VMEM
        return 48 << 20, 64 << 20
    return 28 << 20, 40 << 20          # v7x: 64 MiB per TensorCore


def _pick_tile(nc, per_channel_bytes, block_budget_bytes):
    # Largest channel tile whose pipelined footprint stays within budget.
    tc = max(1, min(nc, 1024))
    while tc > 1 and tc * per_channel_bytes > block_budget_bytes:
        tc = (tc + 1) // 2
    # v7x megacore: make sure the parallel grid has at least 2 steps.
    if nc >= 2 and pl.cdiv(nc, tc) < 2:
        tc = pl.cdiv(nc, 2)
    return int(tc)


# ----------------------------------------------------------------------------
# Forward
# ----------------------------------------------------------------------------
def avg_pool_layer(x_nchw, stride):
    """Forward of AvgPoolLayer: AvgPool2d(kernel_size=3, stride, padding=1), NCHW."""
    N, C, H, W = x_nchw.shape
    Ho = (H + 2 - 3) // stride + 1
    Wo = (W + 2 - 3) // stride + 1
    NC = N * C
    x_flat = x_nchw.reshape(NC, H, W)            # free view; per-channel op

    block_budget, vmem_limit = _vmem_params()
    isz = x_nchw.dtype.itemsize
    compute_dtype = jnp.bfloat16 if x_nchw.dtype == jnp.bfloat16 else jnp.float32
    csz = jnp.dtype(compute_dtype).itemsize

    cparams = pltpu.CompilerParams(
        dimension_semantics=("parallel",),
        vmem_limit_bytes=int(vmem_limit),
    )

    if stride == 1:
        per_ch = 2 * H * W * isz + 2 * H * W * isz + (H + 2) * (W + 2) * csz
        tc = _pick_tile(NC, per_ch, block_budget)
        out_flat = pl.pallas_call(
            _avgpool3x3_s1_kernel,
            out_shape=jax.ShapeDtypeStruct((NC, Ho, Wo), x_nchw.dtype),
            grid_spec=pltpu.PrefetchScalarGridSpec(
                num_scalar_prefetch=0,
                grid=(pl.cdiv(NC, tc),),
                in_specs=[pl.BlockSpec((tc, H, W), lambda i: (i, 0, 0))],
                out_specs=pl.BlockSpec((tc, Ho, Wo), lambda i: (i, 0, 0)),
                scratch_shapes=[pltpu.VMEM((tc, H + 2, W + 2), compute_dtype)],
            ),
            compiler_params=cparams,
        )(x_flat)
        return out_flat.reshape(N, C, Ho, Wo)

    # stride > 1: banded-matmul path.
    ah_t = _band_matrix_t(H, Ho, stride)   # (H, Ho)
    aw_t = _band_matrix_t(W, Wo, stride)   # (W, Wo)
    per_ch = 2 * H * W * isz + 2 * Ho * Wo * isz + 4 * (H * Wo + Wo * Ho) * 4
    tc = _pick_tile(NC, per_ch, block_budget)
    out_flat = pl.pallas_call(
        _avgpool3x3_strided_kernel,
        out_shape=jax.ShapeDtypeStruct((NC, Ho, Wo), x_nchw.dtype),
        grid_spec=pltpu.PrefetchScalarGridSpec(
            num_scalar_prefetch=0,
            grid=(pl.cdiv(NC, tc),),
            in_specs=[
                pl.BlockSpec((H, Ho), lambda i: (0, 0)),
                pl.BlockSpec((W, Wo), lambda i: (0, 0)),
                pl.BlockSpec((tc, H, W), lambda i: (i, 0, 0)),
            ],
            out_specs=pl.BlockSpec((tc, Ho, Wo), lambda i: (i, 0, 0)),
        ),
        compiler_params=cparams,
    )(ah_t, aw_t, x_flat)
    return out_flat.reshape(N, C, Ho, Wo)


# ----------------------------------------------------------------------------
# Self-test
# ----------------------------------------------------------------------------
def _reference_avgpool(x, stride):
    n, c, h, w = x.shape
    ho = (h + 2 - 3) // stride + 1
    wo = (w + 2 - 3) // stride + 1
    xp = jnp.pad(x, ((0, 0), (0, 0), (1, 1), (1, 1)))
    acc = jnp.zeros((n, c, ho, wo), jnp.float32)
    for di in range(3):
        for dj in range(3):
            acc = acc + xp[:, :,
                           di: di + stride * (ho - 1) + 1: stride,
                           dj: dj + stride * (wo - 1) + 1: stride]
    return acc / 9.0


if __name__ == "__main__":
    key = jax.random.PRNGKey(0)
    N, C, H, W = 2, 4, 16, 16
    x = jax.random.normal(key, (N, C, H, W), dtype=jnp.float32)

    # stride=2 exercises the banded-matmul path (AvgPoolLayer(in_channels=4, stride=2));
    # stride=1 exercises the separable shifted-add path.
    for stride in (2, 1):
        y = jax.block_until_ready(avg_pool_layer(x, stride))
        ref = _reference_avgpool(x, stride)
        assert y.shape == ref.shape, (stride, y.shape, ref.shape)
        assert jnp.allclose(y, ref, atol=1e-4, rtol=1e-4), f"mismatch (stride={stride})"

    # TODO(synk): backward() in the PyTorch module is torch.autograd.functional.vjp
    # of this forward; in JAX that is jax.vjp(lambda t: avg_pool_layer(t, stride), x)
    # (autodiff of the wrapper), not a separate Pallas kernel.
    # update_weights / _initialize_weights are no-ops (the layer has no parameters).
    print("KERNEL_OK")
</pallas_src>

<mosaic_0001>
module attributes {stable_mosaic.version = 11 : i64} {
  func.func @_avgpool3x3_strided_kernel(%arg0: i32, %arg1: memref<16x8xf32, #tpu.memory_space<vmem>>, %arg2: memref<16x8xf32, #tpu.memory_space<vmem>>, %arg3: memref<4x16x16xf32, #tpu.memory_space<vmem>>, %arg4: memref<4x8x8xf32, #tpu.memory_space<vmem>>) attributes {dimension_semantics = [#tpu.dimension_semantics<parallel>], iteration_bounds = array<i64: 2>, scalar_prefetch = 0 : i64, scratch_operands = 0 : i64, tpu.core_type = #tpu.core_type<tc>, window_params = [{pipeline_mode = #tpu.pipeline_mode<synchronous>, transform_indices = @transform_0, window_bounds = array<i64: 16, 8>}, {pipeline_mode = #tpu.pipeline_mode<synchronous>, transform_indices = @transform_1, window_bounds = array<i64: 16, 8>}, {transform_indices = @transform_2, window_bounds = array<i64: 4, 16, 16>}, {transform_indices = @transform_3, window_bounds = array<i64: 4, 8, 8>}]} {
    %c0 = arith.constant 0 : index
    %c0_0 = arith.constant 0 : index
    %c0_1 = arith.constant 0 : index
    %0 = vector.load %arg3[%c0, %c0_0, %c0_1] : memref<4x16x16xf32, #tpu.memory_space<vmem>>, vector<4x16x16xf32>
    %c0_2 = arith.constant 0 : index
    %c0_3 = arith.constant 0 : index
    %1 = vector.load %arg1[%c0_2, %c0_3] : memref<16x8xf32, #tpu.memory_space<vmem>>, vector<16x8xf32>
    %c0_4 = arith.constant 0 : index
    %c0_5 = arith.constant 0 : index
    %2 = vector.load %arg2[%c0_4, %c0_5] : memref<16x8xf32, #tpu.memory_space<vmem>>, vector<16x8xf32>
    %3 = vector.shape_cast %0 : vector<4x16x16xf32> to vector<64x16xf32>
    %cst = arith.constant dense<0.000000e+00> : vector<64x8xf32>
    %4 = tpu.matmul %3, %2, %cst {dimension_numbers = #tpu.dot_dimension_numbers<[1], [0], [0], [1], [0, 0, 1, 1], [], []>, precision = #tpu.contract_precision<fp32>} : vector<64x16xf32>, vector<16x8xf32>, vector<64x8xf32> -> vector<64x8xf32>
    %5 = vector.shape_cast %4 : vector<64x8xf32> to vector<4x16x8xf32>
    %6 = tpu.transpose %5, [0, 2, 1] : vector<4x16x8xf32> -> vector<4x8x16xf32>
    %7 = vector.shape_cast %6 : vector<4x8x16xf32> to vector<32x16xf32>
    %cst_6 = arith.constant dense<0.000000e+00> : vector<32x8xf32>
    %8 = tpu.matmul %7, %1, %cst_6 {dimension_numbers = #tpu.dot_dimension_numbers<[1], [0], [0], [1], [0, 0, 1, 1], [], []>, precision = #tpu.contract_precision<fp32>} : vector<32x16xf32>, vector<16x8xf32>, vector<32x8xf32> -> vector<32x8xf32>
    %9 = vector.shape_cast %8 : vector<32x8xf32> to vector<4x8x8xf32>
    %10 = tpu.transpose %9, [0, 2, 1] : vector<4x8x8xf32> -> vector<4x8x8xf32>
    %cst_7 = arith.constant 0.111111112 : f32
    %11 = vector.broadcast %cst_7 : f32 to vector<4x8x8xf32>
    %12 = arith.mulf %10, %11 : vector<4x8x8xf32>
    %c0_8 = arith.constant 0 : index
    %c0_9 = arith.constant 0 : index
    %c0_10 = arith.constant 0 : index
    %13 = vector.load %arg4[%c0_8, %c0_9, %c0_10] : memref<4x8x8xf32, #tpu.memory_space<vmem>>, vector<4x8x8xf32>
    tpu.vector_store %arg4[%c0_8, %c0_9, %c0_10], %12 {strides = array<i32>} : memref<4x8x8xf32, #tpu.memory_space<vmem>>, vector<4x8x8xf32>,
    return
  }
  func.func @transform_0(%arg0: i32) -> (i32, i32) {
    %c0_i32 = arith.constant 0 : i32
    %c0_i32_0 = arith.constant 0 : i32
    %c0_i32_1 = arith.constant 0 : i32
    return %c0_i32, %c0_i32_0 : i32, i32
  }
  func.func @transform_1(%arg0: i32) -> (i32, i32) {
    %c0_i32 = arith.constant 0 : i32
    %c0_i32_0 = arith.constant 0 : i32
    %c0_i32_1 = arith.constant 0 : i32
    return %c0_i32, %c0_i32_0 : i32, i32
  }
  func.func @transform_2(%arg0: i32) -> (i32, i32, i32) {
    %c0_i32 = arith.constant 0 : i32
    %c0_i32_0 = arith.constant 0 : i32
    %c0_i32_1 = arith.constant 0 : i32
    return %arg0, %c0_i32, %c0_i32_0 : i32, i32, i32
  }
  func.func @transform_3(%arg0: i32) -> (i32, i32, i32) {
    %c0_i32 = arith.constant 0 : i32
    %c0_i32_0 = arith.constant 0 : i32
    %c0_i32_1 = arith.constant 0 : i32
    return %arg0, %c0_i32, %c0_i32_0 : i32, i32, i32
  }
}

</mosaic_0001>

<bundles_post_ra>
// kernel: tpu_custom_call.1
= control target key start
LH: loop header
LB: loop body
LE: loop exit
PB: predicated region body
PF: predicated region fallthrough
CT: control target
= control target key end

     0   :  { %8 = vsyncpa [#allocation3], 0  ;;  %s3007_s0 = inlined_call_operand.hbm [shape: f32[16,8], index: 0, kind: input, shape index: {}]   ;;  %s3008_s1 = inlined_call_operand.hbm [shape: f32[16,8], index: 1, kind: input, shape index: {}]   ;;  %s3009_s2 = inlined_call_operand.hbm [shape: f32[8,16,16], index: 2, kind: input, shape index: {}]   ;;  %s3010_s3 = inlined_call_operand.hbm [shape: f32[8,8,8], index: 3, kind: output, shape index: {}]  }
   0x1   :  { %9 = vsyncpa [#allocation6], 0 }
   0x2   :  { %10 = vsyncpa [#allocation4], 0 }
   0x3   :  { %12 = vsyncpa [#allocation4 + $0x1], 0  ;;  %s2633_s12 = smov 0   ;;  %s2635_s13 = smov 0  }
   0x4   :  { %s2637_s14 = smov 0   ;;  %s2639_s15 = smov 0  }
   0x5 LB: > { %s2654_s16 = sadd.s32 4294967295, %s2603_s15   ;;  %s1987_s17 = sadd.s32 4294967294, %s2603_s15   ;;  %s2603_s15 = sphi %s2639_s15, %s3038_s15   ;;  %s2599_s14 = sphi %s2637_s14, %s3037_s14   ;;  %s2595_s13 = sphi %s2635_s13, %s3036_s13   ;;  %s2591_s12 = sphi %s2633_s12, %s3035_s12  }
   0x6   : > { %s2658_s18 = sadd.s32 1, %s2603_s15   ;;  %s67_s19 = sadd.s32 1, %s2599_s14 }
   0x7   : > { %s64_s20 = ssub.s32 %s2603_s15, %s2658_s18  ;;  %p74_p0 = scmp.ne.s32.totalorder %s2599_s14, %s2595_s13 }
   0x8   : > { %p65_p1 = scmp.eq.s32.totalorder %s64_s20, 0  ;;  %p75_p2 = scmp.eq.s32.totalorder %s2603_s15, 0 }
   0x9   : > { %p80_p3 = scmp.ne.s32.totalorder %s2595_s13, %s2591_s12  ;;  %p3011_p4 = scmp.eq.s32.totalorder %s2654_s16, 0 }
   0xa   : > { %s2670_s21 = scalar_select %p65_p1, %s2599_s14, %s67_s19  }
   0xb   : > { %p2672_p5 = por %p75_p2, %p74_p0  ;;  %p2678_p6 = por %p3011_p4, %p80_p3 }
   0xc   : > { %p104_p7 = scmp.eq.s32.totalorder %s2654_s16, 1  ;;  %p110_p8 = scmp.eq.s32.totalorder %s1987_s17, 1 }
   0xd   : > { %s3016_s22 = scalar_select %p2672_p5, 1, 0 }
   0xe   : > { %s3017_s23 = scalar_select %p2678_p6, 1, 0 }
   0xf   : > { %p1988_p9 = scmp.ge.s32.totalorder %s2603_s15, 1  ;;  %p117_p10 = scmp.lt.s32.totalorder %s2603_s15, 3 }
  0x10   : > { %p2685_p11 = por %p104_p7, %p74_p0  ;;  %p2689_p12 = por %p110_p8, %p80_p3 }
  0x11   : > { %p2693_p13 = pnand %p1988_p9, %p117_p10  ;;  %s2605_s27 = smov [#allocation2]  }
  0x12   : > { %s3018_s24 = scalar_select %p2685_p11, 1, 0 }
  0x13   : > { %s3019_s25 = scalar_select %p2689_p12, 1, 0 }
  0x14   : > { %s3020_s26 = scalar_select %p2693_p13, 1, 0 }
  0x15   : > { %p2383_p1 = pneg %p2693_p13  ;;  %s129_s28 = sshll.u32 %s2605_s27, 4  ;;  %s130_s28 = int_to_ptr.vmem [resolvable:$true] %s129_s28 }
  0x16   : > { %s2606_s30 = smov [#allocation5]   ;;  %s2443_s7 = scalar_lea.hbm %s3007_s0, 256 }
  0x17   : > { %p2701_p2 = pnand %p2383_p1, %p3011_p4  ;;  %s142_s4 = sshll.u32 %s2606_s30, 4  ;;  %s143_s4 = int_to_ptr.vmem [resolvable:$true] %s142_s4 }
  0x18   : > { %p2444_p7 = scmp.ne.s32.totalorder %s3007_s0, %s2443_s7  ;;  %p2450_p1 = scmp.lt.u32.totalorder %s2443_s7, %s3007_s0 }
  0x19   : > { %p2445_p8 = pneg %p2701_p2 }
  0x1b   : > { %p2446_p9 = pnand %p2445_p8, %p2444_p7 }
  0x1d   : > { %p2447_p10 = pneg %p2446_p9 }
  0x1f   : > { %p2452_p0 = pnand %p2450_p1, %p2447_p10 }
  0x21   : > { %2455 = shalt.err (!%p2452_p0)
}
  0x22   : > { %s2456_s17 = scalar_lea.vmem %s130_s28, 256  ;;  %p2464_p11 = scmp.lt.s32.totalorder %s130_s28, %s130_s28 }
  0x23   : > { %p2457_p4 = scmp.ne.s32.totalorder %s130_s28, %s2456_s17  ;;  %p2465_p6 = scmp.lt.s32.totalorder %s2456_s17, %s2456_s17 }
  0x25   : > { %p2459_p3 = pnand %p2457_p4, %p2445_p8  ;;  %p2466_p13 = por %p2465_p6, %p2464_p11 }
  0x27   : > { %p2460_p12 = pneg %p2459_p3 }
  0x29   : > { %p2467_p5 = pnand %p2466_p13, %p2460_p12 }
  0x2b   : > { %2470 = shalt.err (!%p2467_p5)
}
  0x2c   : > { %s2607_s19 = smov 128   ;;  %s2608_s20 = smov 8  }
  0x2d   : > { %2386 = dma.hbm_to_vmem [thread:$0]  (!%p2701_p2), %s3007_s0, 256, %s130_s28, [#allocation3], %s2607_s19, %s2607_s19, %s2608_s20  }
  0x2e   : > { %p3022_p4 = scmp.ne.s32.totalorder %s3016_s22, 0  ;;  %p3023_p0 = scmp.lt.s32.totalorder %s2603_s15, 2 }
  0x2f   : > { %s2471_s8 = scalar_lea.hbm %s3008_s1, 256 }
  0x30   : > { %p2736_p3 = pnand %p3023_p0, %p3022_p4  ;;  %p2472_p5 = scmp.ne.s32.totalorder %s3008_s1, %s2471_s8 }
  0x31   : > { %p2478_p12 = scmp.lt.u32.totalorder %s2471_s8, %s3008_s1 }
  0x32   : > { %s3024_s5 = scalar_select %p2736_p3, 1, 0 }
  0x33   : > { %p2474_p6 = pnand %p2472_p5, %p2445_p8 }
  0x35   : > { %p2475_p11 = pneg %p2474_p6 }
  0x37   : > { %p2480_p13 = pnand %p2478_p12, %p2475_p11 }
  0x39   : > { %2483 = shalt.err (!%p2480_p13)
}
  0x3a   : > { %s2484_s11 = scalar_lea.vmem %s143_s4, 256  ;;  %p2492_p1 = scmp.lt.s32.totalorder %s143_s4, %s143_s4 }
  0x3b   : > { %p2485_p7 = scmp.ne.s32.totalorder %s143_s4, %s2484_s11  ;;  %p2493_p4 = scmp.lt.s32.totalorder %s2484_s11, %s2484_s11 }
  0x3d   : > { %p2487_p9 = pnand %p2485_p7, %p2445_p8  ;;  %p2494_p0 = por %p2493_p4, %p2492_p1 }
  0x3f   : > { %p2488_p10 = pneg %p2487_p9 }
  0x41   : > { %p2495_p3 = pnand %p2494_p0, %p2488_p10 }
  0x43   : > { %2498 = shalt.err (!%p2495_p3)
}
  0x44   : > { %2389 = dma.hbm_to_vmem [thread:$0]  (!%p2701_p2), %s3008_s1, 256, %s143_s4, [#allocation6], %s2607_s19, %s2607_s19, %s2608_s20  }
  0x45   : > { %s156_s30 = sand.u32 1, %s2603_s15   ;;  %s158_s6 = sand.u32 1, %s2599_s14  }
  0x46   : > { %s1992_s7 = sshll.u32 %s158_s6, 6  ;;  %s2007_s8 = sshll.u32 %s2603_s15, 10 }
  0x47   : > { %s2769_s29 = scalar_lea.hbm %s3009_s2, %s2007_s8  ;;  %s160_s28 = scalar_lea.vmem [#allocation7], %s1992_s7 }
  0x48   : > { %s168_s22 = sshll.u32 %s160_s28, 4  ;;  %s2773_s11 = scalar_lea.sflag [#allocation3], %s156_s30  ;;  %s2771_s22 = int_to_ptr.vmem [resolvable:$true] %s168_s22 }
  0x49   : > { %s2499_s4 = scalar_lea.hbm %s2769_s29, 1024  ;;  %p3025_p8 = scmp.ne.s32.totalorder %s3024_s5, 0 }
  0x4a   : > { %p2500_p2 = scmp.ne.s32.totalorder %s2769_s29, %s2499_s4  ;;  %s2504_s6 = scalar_lea.hbm %s3009_s2, 2048 }
  0x4b   : > { %p2501_p3 = pneg %p3025_p8  ;;  %p2505_p11 = scmp.lt.u32.totalorder %s2769_s29, %s3009_s2 }
  0x4c   : > { %p2506_p12 = scmp.lt.u32.totalorder %s2504_s6, %s2499_s4  ;;  %p2508_p7 = scmp.lt.u32.totalorder %s2499_s4, %s2769_s29 }
  0x4d   : > { %p2502_p5 = pnand %p2501_p3, %p2500_p2 }
  0x4e   : > { %p2507_p13 = por %p2506_p12, %p2505_p11 }
  0x4f   : > { %p2503_p6 = pneg %p2502_p5 }
  0x50   : > { %p2509_p9 = por %p2508_p7, %p2507_p13 }
  0x52   : > { %p2510_p10 = pnand %p2509_p9, %p2503_p6 }
  0x54   : > { %2513 = shalt.err (!%p2510_p10)
}
  0x55   : > { %s2514_s30 = scalar_lea.vmem %s2771_s22, 1024  ;;  %s2609_s7 = smov [#allocation7]  }
  0x56   : > { %p2515_p1 = scmp.ne.s32.totalorder %s2771_s22, %s2514_s30  ;;  %s2519_s10 = sshll.u32 %s2609_s7, 4  ;;  %s2520_s10 = int_to_ptr.vmem [resolvable:$false] %s2519_s10 }
  0x57   : > { %s2521_s28 = scalar_lea.vmem %s2520_s10, 2048  ;;  %p2522_p2 = scmp.lt.s32.totalorder %s2771_s22, %s2520_s10 }
  0x58   : > { %p2517_p4 = pnand %p2515_p1, %p2501_p3  ;;  %p2523_p5 = scmp.lt.s32.totalorder %s2521_s28, %s2514_s30 }
  0x5a   : > { %p2518_p0 = pneg %p2517_p4  ;;  %p2524_p11 = por %p2523_p5, %p2522_p2 }
  0x5c   : > { %p2525_p12 = pnand %p2524_p11, %p2518_p0 }
  0x5e   : > { %2528 = shalt.err (!%p2525_p12)
}
  0x5f   : > { %2393 = dma.hbm_to_vmem [thread:$0]  (!%p3025_p8), %s2769_s29, 1024, %s2771_s22, %s2773_s11, %s2607_s19, %s2607_s19, %s2608_s20  }
  0x60   : > { %p3026_p3 = scmp.ne.s32.totalorder %s3020_s26, 0 }
  0x61   : > { %p3027_p6 = scmp.eq.s32.totalorder (!%p3026_p3), %s2654_s16, 0 }
  0x62   : > { %180 = sbr.rel (%p3026_p3) target bundleno = 953 (0x3b9), region = 32 }
  0x69   : > { %2574 = dma.done.wait (%p3027_p6), [#allocation3], 256   ;;  %p3028_p13 = pmov %p3027_p6 }
  0x6a   : > { %p3029_p7 = pmov %p3027_p6 }
  0x6b   : > { %2576 = vsyncadd (%p3028_p13), [#allocation3], 4294967040 }
  0x6c   : > { %2578 = dma.done.wait (%p3029_p7), [#allocation6], 256   ;;  %p3030_p9 = pmov %p3027_p6 }
  0x6d   : > { %s190_s5 = sand.u32 1, %s2654_s16   ;;  %s2816_s19 = sand.u32 1, %s2595_s13  }
  0x6e   : > { %2580 = vsyncadd (%p3030_p9), [#allocation6], 4294967040  ;;  %s1999_s26 = sshll.u32 %s2816_s19, 6  ;;  %s191_s20 = scalar_lea.sflag [#allocation3], %s190_s5 }
  0x6f   : > { %s2819_s29 = scalar_lea.vmem [#allocation7], %s1999_s26  ;;  %p3031_p8 = scmp.ne.s32.totalorder %s3017_s23, 0 }
  0x71   : > { %2582 = dma.done.wait (%p3031_p8), %s191_s20, 1024  }
  0x72   : > { %2584 = vsyncadd (%p3031_p8), %s191_s20, 4294966272  ;;  %vm231_vm0 = vcmask 130048   ;;  %v229_v0 = vld [vmem:[#allocation5] sm:$0xff]  ;;  %v230_v1 = vld [vmem:[#allocation5 + $0x8] sm:$0xff]  ;;  %s2000_s23 = sshll.u32 %s2816_s19, 5  ;;  %vm1876_vm1 = vcmask 64512  }
  0x73   : > { %v219_v2 = vld [vmem:[%s2819_s29] sm:$0xff]  ;;  %v257_v3 = vand.u32 4294901760, %v229_v0  ;;  %v260_v4 = vand.u32 4294901760, %v230_v1  ;;  %v220_v6 = vld [vmem:[%s2819_s29 + $0x8] sm:$0xff]  ;;  %v221_v7 = vld [vmem:[%s2819_s29 + $0x10] sm:$0xff]  ;;  %s216_s22 = scalar_lea.vmem [#allocation8], %s2000_s23 }
  0x74   : > { %v233_v5 = vsel %vm231_vm0, %v219_v2, 0  ;;  %v222_v8 = vld [vmem:[%s2819_s29 + $0x18] sm:$0xff]  ;;  %v223_v10 = vld [vmem:[%s2819_s29 + $0x20] sm:$0xff]  ;;  %v236_v13 = vsel %vm231_vm0, %v220_v6, 0  ;;  %v239_v14 = vsel %vm231_vm0, %v221_v7, 0  ;;  %v224_v15 = vld [vmem:[%s2819_s29 + $0x28] sm:$0xff] }
  0x75   : > { %v2830_v9 = vand.u32 4294901760, %v233_v5  ;;  %v2833_v11 = vsub.f32 %v229_v0, %v257_v3  ;;  %v2835_v12 = vsub.f32 %v230_v1, %v260_v4  ;;  %v242_v16 = vsel %vm231_vm0, %v222_v8, 0  ;;  %v225_v21 = vld [vmem:[%s2819_s29 + $0x30] sm:$0xff]  ;;  %v226_v30 = vld [vmem:[%s2819_s29 + $0x38] sm:$0xff]  ;;  %s1895_s11 = sshll.u32 %s216_s22, 4  ;;  %s2008_s4 = sshll.u32 %s2654_s16, 9  ;;  %s2955_s11 = int_to_ptr.vmem [resolvable:$true] %s1895_s11 }
  0x76   : > { %v2842_v17 = vpack.c.bf16 %v260_v4, %v257_v3  ;;  %v245_v18 = vsel %vm231_vm0, %v223_v10, 0  ;;  %v2848_v22 = vand.u32 4294901760, %v236_v13  ;;  %v2850_v23 = vand.u32 4294901760, %v239_v14  ;;  %s2961_s6 = scalar_lea.hbm %s3010_s3, %s2008_s4  ;;  %s1882_s16 = scalar_lea.sflag [#allocation4], %s2816_s19 }
  0x77   : > { %2125 = vmatprep.mubr.f32.mxu0 %v2830_v9  ;;  %v406_v19 = vand.u32 4294901760, %v2833_v11  ;;  %v413_v20 = vand.u32 4294901760, %v2835_v12  ;;  %v2852_v24 = vand.u32 4294901760, %v245_v18  ;;  %v248_v25 = vsel %vm231_vm0, %v224_v15, 0  ;;  %s2529_s8 = scalar_lea.vmem %s2955_s11, 512  ;;  %p3032_p1 = scmp.ne.s32.totalorder %s3018_s24, 0 }
  0x78   : > { %2262 = vmatprep.subr.bf16.mxu1 %v2842_v17  ;;  %v2862_v28 = vand.u32 4294901760, %v242_v16  ;;  %v2865_v29 = vsub.f32 %v233_v5, %v2830_v9  ;;  %v2870_v31 = vsub.f32 %v236_v13, %v2848_v22  ;;  %v2269_v32 = vpack.c.bf16 %v2835_v12, %v2833_v11  ;;  %p2530_p10 = scmp.ne.s32.totalorder %s2955_s11, %s2529_s8  ;;  %s2610_s9 = smov [#allocation8]  }
  0x79   : > { %v407_v26 = vsub.f32 %v2833_v11, %v406_v19  ;;  %v414_v27 = vsub.f32 %v2835_v12, %v413_v20  ;;  %2264 = vmatpush3.bf16.msra.mxu1 %v2842_v17  ;;  %v2875_v33 = vsub.f32 %v239_v14, %v2850_v23  ;;  %v251_v34 = vsel %vm231_vm0, %v225_v21, 0  ;;  %s2533_s30 = sshll.u32 %s2610_s9, 4  ;;  %s2534_s30 = int_to_ptr.vmem [resolvable:$false] %s2533_s30 }
  0x7a   : > { %v2879_v37 = vsub.f32 %v242_v16, %v2862_v28  ;;  %v2881_v38 = vand.u32 4294901760, %v248_v25  ;;  %v2884_v39 = vsub.f32 %v245_v18, %v2852_v24  ;;  %v254_v40 = vsel %vm231_vm0, %v226_v30, 0  ;;  %p2531_p4 = pnand %p2530_p10, %p3032_p1  ;;  %s2535_s7 = scalar_lea.vmem %s2534_s30, 1024 }
  0x7b   : > { %v408_v35 = vand.u32 4294901760, %v407_v26  ;;  %v415_v36 = vand.u32 4294901760, %v414_v27  ;;  %v325_v41 = vand.u32 4294901760, %v2865_v29  ;;  %v335_v42 = vand.u32 4294901760, %v2870_v31  ;;  %p2536_p2 = scmp.lt.s32.totalorder %s2955_s11, %s2534_s30  ;;  %p2537_p5 = scmp.lt.s32.totalorder %s2535_s7, %s2529_s8 }
  0x7c   : > { %v2889_v44 = vand.u32 4294901760, %v251_v34  ;;  %v345_v45 = vand.u32 4294901760, %v2875_v33  ;;  %v355_v46 = vand.u32 4294901760, %v2879_v37  ;;  %v365_v47 = vand.u32 4294901760, %v2884_v39  ;;  %p2532_p0 = pneg %p2531_p4 }
  0x7d   : > { %v2265_v43 = vpack.c.bf16 %v415_v36, %v408_v35  ;;  %v326_v48 = vsub.f32 %v2865_v29, %v325_v41  ;;  %v336_v49 = vsub.f32 %v2870_v31, %v335_v42  ;;  %v374_v50 = vsub.f32 %v248_v25, %v2881_v38  ;;  %p2538_p11 = por %p2537_p5, %p2536_p2 }
  0x7e   : > { %v2897_v51 = vand.u32 4294901760, %v254_v40  ;;  %v346_v52 = vsub.f32 %v2875_v33, %v345_v45  ;;  %v356_v53 = vsub.f32 %v2879_v37, %v355_v46  ;;  %v366_v56 = vsub.f32 %v2884_v39, %v365_v47 }
  0x7f   : > { %2266 = vmatprep.subr.bf16.mxu0 %v2265_v43  ;;  %2309 = vmatprep.subr.bf16.mxu1 %v2265_v43  ;;  %v327_v54 = vand.u32 4294901760, %v326_v48  ;;  %v337_v55 = vand.u32 4294901760, %v336_v49  ;;  %v384_v57 = vsub.f32 %v251_v34, %v2889_v44  ;;  %v375_v58 = vand.u32 4294901760, %v374_v50  ;;  %p2539_p12 = pnand %p2538_p11, %p2532_p0 }
  0x80   : > { %2268 = vmatpush3.bf16.msra.mxu0 %v2265_v43  ;;  %v347_v59 = vand.u32 4294901760, %v346_v52  ;;  %v394_v60 = vsub.f32 %v254_v40, %v2897_v51  ;;  %v357_v62 = vand.u32 4294901760, %v356_v53  ;;  %v367_v0 = vand.u32 4294901760, %v366_v56 }
  0x81   : > { %2270 = vmatprep.subr.bf16.mxu0 %v2269_v32  ;;  %2109 = vmatprep.mubr.f32.mxu1 %v327_v54  ;;  %v385_v61 = vand.u32 4294901760, %v384_v57  ;;  %v376_v63 = vsub.f32 %v374_v50, %v375_v58  ;;  %v2277_v5 = vpack.c.bf16 %v413_v20, %v406_v19 }
  0x82   : > { %2110 = vmatmul.mubr.f32.vlgmr.msra.gmra.mrb[0].mxu1 %v337_v55  ;;  %v395_v1 = vand.u32 4294901760, %v394_v60 }
  0x83   : > { %2126 = vmatmul.mubr.f32.vlgmr.msra.gmra.mrb[0].mxu0 %v2848_v22  ;;  %2112 = vmatprep.mubr.f32.mxu1 %v347_v59  ;;  %v386_v2 = vsub.f32 %v384_v57, %v385_v61  ;;  %v377_v3 = vand.u32 4294901760, %v376_v63 }
  0x84   : > { %2272 = vmatpush3.bf16.msra.mxu0 %v2269_v32  ;;  %2128 = vmatprep.mubr.f32.mxu0 %v2850_v23  ;;  %v396_v4 = vsub.f32 %v394_v60, %v395_v1 }
  0x85   : > { %2274 = vmatprep.subr.bf16.mxu0 %v2842_v17  ;;  %2310 = vmatpush3.bf16.msra.mxu1 %v2265_v43  ;;  %v387_v6 = vand.u32 4294901760, %v386_v2 }
  0x86   : > { %2113 = vmatmul.mubr.f32.gmra.mrb[2].mxu1 %v357_v62  ;;  %v397_v7 = vand.u32 4294901760, %v396_v4 }
  0x87   : > { %2129 = vmatmul.mubr.f32.gmra.mrb[2].mxu0 %v2862_v28  ;;  %2115 = vmatprep.mubr.f32.mxu1 %v367_v0 }
  0x88   : > { %2141 = vmatprep.mubr.f32.mxu0 %v2865_v29  ;;  %v228_v29 = vld [vmem:[#allocation2 + $0x8] sm:$0xff] }
  0x89   : > { %v1160_v32 = vand.u32 4294901760, %v228_v29 }
  0x8a   : > { %2116 = vmatmul.mubr.f32.gmra.mrb[4].mxu1 %v377_v3 }
  0x8b   : > { %2142 = vmatmul.mubr.f32.vlgmr.msra.gmra.mrb[0].mxu0 %v2870_v31  ;;  %2118 = vmatprep.mubr.f32.mxu1 %v387_v6 }
  0x8c   : > { %2276 = vmatpush3.bf16.msra.mxu0 %v2842_v17  ;;  %2144 = vmatprep.mubr.f32.mxu0 %v2875_v33 }
  0x8d   : > { %2278 = vmatprep.subr.bf16.mxu0 %v2277_v5 }
  0x8e   : > { %2119 = vmatmul.mubr.f32.gmra.mrb[6].mxu1 %v397_v7 }
  0x8f   : > { %2145 = vmatmul.mubr.f32.gmra.mrb[2].mxu0 %v2879_v37  ;;  %2131 = vmatprep.mubr.f32.mxu1 %v2852_v24 }
  0x90   : > { %2147 = vmatprep.mubr.f32.mxu0 %v2884_v39 }
  0x92   : > { %2132 = vmatmul.mubr.f32.vlgmr.msra.gmra.mrb[4].mxu1 %v2881_v38 }
  0x93   : > { %2148 = vmatmul.mubr.f32.gmra.mrb[4].mxu0 %v374_v50  ;;  %2134 = vmatprep.mubr.f32.mxu1 %v2889_v44 }
  0x94   : > { %2150 = vmatprep.mubr.f32.mxu0 %v384_v57 }
  0x96   : > { %2135 = vmatmul.mubr.f32.gmra.mrb[6].mxu1 %v2897_v51 }
  0x97   : > { %2151 = vmatmul.mubr.f32.gmra.mrb[6].mxu0 %v394_v60 }
  0x98   : > { %2157 = vmatprep.mubr.f32.mxu0 %v325_v41 }
  0x9b   : > { %2158 = vmatmul.mubr.f32.vlgmr.msra.gmra.mrb[0].mxu0 %v335_v42 }
  0x9c   : > { %2280 = vmatpush3.bf16.msra.mxu0 %v2277_v5  ;;  %2160 = vmatprep.mubr.f32.mxu0 %v345_v45 }
  0x9d   : > { %2282 = vmatprep.subr.bf16.mxu0 %v2842_v17 }
  0x9f   : > { %2161 = vmatmul.mubr.f32.gmra.mrb[2].mxu0 %v355_v46 }
  0xa0   : > { %2163 = vmatprep.mubr.f32.mxu0 %v365_v47 }
  0xa3   : > { %2164 = vmatmul.mubr.f32.gmra.mrb[4].mxu0 %v375_v58 }
  0xa4   : > { %2166 = vmatprep.mubr.f32.mxu0 %v385_v61 }
  0xa7   : > { %2167 = vmatmul.mubr.f32.gmra.mrb[6].mxu0 %v395_v1 }
  0xa8   : > { %2173 = vmatprep.mubr.f32.mxu0 %v2830_v9 }
  0xab   : > { %2174 = vmatmul.mubr.f32.vlgmr.msra.gmra.mrb[0].mxu0 %v2848_v22 }
  0xac   : > { %2284 = vmatpush3.bf16.msra.mxu0 %v2842_v17  ;;  %2176 = vmatprep.mubr.f32.mxu0 %v2850_v23 }
  0xaf   : > { %2177 = vmatmul.mubr.f32.gmra.mrb[2].mxu0 %v2862_v28 }
  0xb0   : > { %2179 = vmatprep.mubr.f32.mxu0 %v2852_v24 }
  0xb3   : > { %2180 = vmatmul.mubr.f32.gmra.mrb[4].mxu0 %v2881_v38 }
  0xb4   : > { %2182 = vmatprep.mubr.f32.mxu0 %v2889_v44 }
  0xb7   : > { %2183 = vmatmul.mubr.f32.gmra.mrb[6].mxu0 %v2897_v51 }
  0xb8   : > { %2189 = vmatprep.mubr.f32.mxu0 %v2830_v9 }
  0xbb   : > { %2190 = vmatmul.mubr.f32.vlgmr.msra.gmra.mrb[0].mxu0 %v2848_v22 }
  0xbc   : > { %2192 = vmatprep.mubr.f32.mxu0 %v2850_v23 }
  0xbf   : > { %2193 = vmatmul.mubr.f32.gmra.mrb[2].mxu0 %v2862_v28  ;;  %v227_v28 = vld [vmem:[#allocation2] sm:$0xff] }
  0xc0   : > { %2195 = vmatprep.mubr.f32.mxu0 %v2852_v24  ;;  %v1157_v31 = vand.u32 4294901760, %v227_v28 }
  0xc2   : > { %v2940_v36 = vpack.c.bf16 %v1160_v32, %v1157_v31  ;;  %v1265_v37 = vsub.f32 %v227_v28, %v1157_v31 }
  0xc3   : > { %2196 = vmatmul.mubr.f32.gmra.mrb[4].mxu0 %v2881_v38  ;;  %v1272_v38 = vsub.f32 %v228_v29, %v1160_v32 }
  0xc4   : > { %2198 = vmatprep.mubr.f32.mxu0 %v2889_v44  ;;  %2286 = vmatprep.subr.bf16.mxu1 %v2940_v36  ;;  %v1266_v39 = vand.u32 4294901760, %v1265_v37 }
  0xc5   : > { %2288 = vmatpush3.bf16.msra.mxu1 %v2940_v36  ;;  %v1273_v40 = vand.u32 4294901760, %v1272_v38  ;;  %v2293_v46 = vpack.c.bf16 %v1272_v38, %v1265_v37 }
  0xc6   : > { %v1267_v41 = vsub.f32 %v1265_v37, %v1266_v39 }
  0xc7   : > { %2199 = vmatmul.mubr.f32.gmra.mrb[6].mxu0 %v2897_v51  ;;  %v1274_v42 = vsub.f32 %v1272_v38, %v1273_v40  ;;  %v2301_v47 = vpack.c.bf16 %v1273_v40, %v1266_v39 }
  0xc8   : > { %v1268_v43 = vand.u32 4294901760, %v1267_v41 }
  0xc9   : > { %v1275_v44 = vand.u32 4294901760, %v1274_v42 }
  0xcb   : > { %v2289_v45 = vpack.c.bf16 %v1275_v44, %v1268_v43 }
  0xcd   : > { %2290 = vmatprep.subr.bf16.mxu1 %v2289_v45 }
 0x155   : > { %v2111_v8 = vpop.f32.mrb[0].mxu1 }
 0x156   : > { %v329_v10 = vpop.f32.mrb[1].mxu1 }
 0x159   : > { %v2114_v11 = vpop.f32.mrb[2].mxu1 }
 0x15a   : > { %v349_v12 = vpop.f32.mrb[3].mxu1 }
 0x165   : > { %v2133_v13 = vpop.f32.mrb[4].mxu1 }
 0x166   : > { %v504_v9 = vpop.f32.mrb[5].mxu1 }
 0x169   : > { %v2136_v14 = vpop.f32.mrb[6].mxu1 }
 0x16a   : > { %v516_v15 = vpop.f32.mrb[7].mxu1 }
 0x18e   : > { %v2191_v16 = vpop.f32.mrb[0].mxu0 }
 0x18f   : > { %v2311_v17 = vadd.f32 %v2191_v16, %v2111_v8  ;;  %v970_v18 = vpop.f32.mrb[1].mxu0 }
 0x190   : > { %v2312_v19 = vadd.f32 %v970_v18, %v329_v10 }
 0x192   : > { %v2194_v20 = vpop.f32.mrb[2].mxu0  ;;  %1016 = vxpose.xlu0.b32.start [1/2] (short) (narrow) %v2312_v19, 8 }
 0x193   : > { %v2313_v21 = vadd.f32 %v2194_v20, %v2114_v11  ;;  %v982_v22 = vpop.f32.mrb[3].mxu0 }
 0x194   : > { %v2314_v23 = vadd.f32 %v982_v22, %v349_v12 }
 0x196   : > { %v2197_v24 = vpop.f32.mrb[4].mxu0  ;;  %1017 = vxpose.xlu0.b32.end [2/2] (short) (narrow) %v2311_v17, 8  ;;  %1048 = vxpose.xlu1.b32.start [1/2] (short) (narrow) %v2314_v23, 8 }
 0x197   : > { %v2315_v25 = vadd.f32 %v2197_v24, %v2133_v13  ;;  %v994_v26 = vpop.f32.mrb[5].mxu0 }
 0x198   : > { %v2316_v27 = vadd.f32 %v994_v26, %v504_v9 }
 0x19a   : > { %v2200_v30 = vpop.f32.mrb[6].mxu0  ;;  %1049 = vxpose.xlu1.b32.end [2/2] (short) (narrow) %v2313_v21, 8  ;;  %1080 = vxpose.xlu0.b32.start [1/2] (short) (narrow) %v2316_v27, 8 }
 0x19b   : > { %v2317_v33 = vadd.f32 %v2200_v30, %v2136_v14  ;;  %v1006_v34 = vpop.f32.mrb[7].mxu0 }
 0x19c   : > { %v2318_v35 = vadd.f32 %v1006_v34, %v516_v15 }
 0x19e   : > { %1081 = vxpose.xlu0.b32.end [2/2] (short) (narrow) %v2315_v25, 8  ;;  %1112 = vxpose.xlu1.b32.start [1/2] (short) (narrow) %v2318_v35, 8 }
 0x1a2   : > { %1113 = vxpose.xlu1.b32.end [2/2] (short) (narrow) %v2317_v33, 8 }
 0x212   : > { %v1032_v48 = vpop.trf.xlu0 }
 0x213   : > { %v1145_v49 = vsel %vm231_vm0, %v1032_v48, 0 }
 0x214   : > { %v1223_v50 = vand.u32 4294901760, %v1145_v49 }
 0x216   : > { %v1224_v51 = vsub.f32 %v1145_v49, %v1223_v50  ;;  %v1064_v52 = vpop.trf.xlu1 }
 0x217   : > { %v1148_v53 = vsel %vm231_vm0, %v1064_v52, 0 }
 0x218   : > { %v1225_v54 = vand.u32 4294901760, %v1224_v51  ;;  %v1233_v55 = vand.u32 4294901760, %v1148_v53 }
 0x21a   : > { %v1234_v56 = vsub.f32 %v1148_v53, %v1233_v55  ;;  %v1096_v57 = vpop.trf.xlu0  ;;  %v1226_v58 = vsub.f32 %v1224_v51, %v1225_v54 }
 0x21b   : > { %v1151_v59 = vsel %vm231_vm0, %v1096_v57, 0 }
 0x21c   : > { %v1235_v60 = vand.u32 4294901760, %v1234_v56  ;;  %v1243_v61 = vand.u32 4294901760, %v1151_v59  ;;  %v1227_v62 = vand.u32 4294901760, %v1226_v58 }
 0x21e   : > { %v1236_v63 = vsub.f32 %v1234_v56, %v1235_v60  ;;  %v1244_v0 = vsub.f32 %v1151_v59, %v1243_v61  ;;  %v1128_v1 = vpop.trf.xlu1  ;;  %2205 = vmatprep.mubr.f32.mxu1 %v1227_v62 }
 0x21f   : > { %v1154_v2 = vsel %vm231_vm0, %v1128_v1, 0 }
 0x220   : > { %v1237_v3 = vand.u32 4294901760, %v1236_v63  ;;  %v1245_v4 = vand.u32 4294901760, %v1244_v0  ;;  %v1253_v5 = vand.u32 4294901760, %v1154_v2 }
 0x222   : > { %v1254_v6 = vsub.f32 %v1154_v2, %v1253_v5  ;;  %2206 = vmatmul.mubr.f32.vlgmr.msra.gmra.mrb[8].mxu1 %v1237_v3  ;;  %v1246_v7 = vsub.f32 %v1244_v0, %v1245_v4 }
 0x223   : > { %2292 = vmatpush3.bf16.msra.mxu1 %v2289_v45 }
 0x224   : > { %v1255_v8 = vand.u32 4294901760, %v1254_v6  ;;  %v1247_v10 = vand.u32 4294901760, %v1246_v7  ;;  %2294 = vmatprep.subr.bf16.mxu1 %v2293_v46 }
 0x226   : > { %2208 = vmatprep.mubr.f32.mxu1 %v1247_v10  ;;  %v1256_v11 = vsub.f32 %v1254_v6, %v1255_v8 }
 0x228   : > { %v1257_v12 = vand.u32 4294901760, %v1256_v11 }
 0x22a   : > { %2209 = vmatmul.mubr.f32.gmra.mrb[10].mxu1 %v1257_v12 }
 0x22b   : > { %2215 = vmatprep.mubr.f32.mxu1 %v1223_v50 }
 0x22e   : > { %2216 = vmatmul.mubr.f32.vlgmr.msra.gmra.mrb[8].mxu1 %v1233_v55 }
 0x22f   : > { %2218 = vmatprep.mubr.f32.mxu1 %v1243_v61  ;;  %2296 = vmatpush3.bf16.msra.mxu1 %v2293_v46 }
 0x230   : > { %2298 = vmatprep.subr.bf16.mxu1 %v2940_v36 }
 0x232   : > { %2219 = vmatmul.mubr.f32.gmra.mrb[10].mxu1 %v1253_v5 }
 0x233   : > { %2225 = vmatprep.mubr.f32.mxu1 %v1224_v51 }
 0x236   : > { %2226 = vmatmul.mubr.f32.vlgmr.msra.gmra.mrb[8].mxu1 %v1234_v56 }
 0x237   : > { %2228 = vmatprep.mubr.f32.mxu1 %v1244_v0  ;;  %2300 = vmatpush3.bf16.msra.mxu1 %v2940_v36 }
 0x238   : > { %2302 = vmatprep.subr.bf16.mxu1 %v2301_v47 }
 0x23a   : > { %2229 = vmatmul.mubr.f32.gmra.mrb[10].mxu1 %v1254_v6 }
 0x23b   : > { %2235 = vmatprep.mubr.f32.mxu1 %v1225_v54 }
 0x23e   : > { %2236 = vmatmul.mubr.f32.vlgmr.msra.gmra.mrb[8].mxu1 %v1235_v60 }
 0x23f   : > { %2238 = vmatprep.mubr.f32.mxu1 %v1245_v4  ;;  %2304 = vmatpush3.bf16.msra.mxu1 %v2301_v47 }
 0x240   : > { %2306 = vmatprep.subr.bf16.mxu1 %v2940_v36 }
 0x242   : > { %2239 = vmatmul.mubr.f32.gmra.mrb[10].mxu1 %v1255_v8 }
 0x243   : > { %2245 = vmatprep.mubr.f32.mxu1 %v1223_v50 }
 0x246   : > { %2246 = vmatmul.mubr.f32.vlgmr.msra.gmra.mrb[8].mxu1 %v1233_v55 }
 0x247   : > { %2248 = vmatprep.mubr.f32.mxu1 %v1243_v61  ;;  %2308 = vmatpush3.bf16.msra.mxu1 %v2940_v36 }
 0x24a   : > { %2249 = vmatmul.mubr.f32.gmra.mrb[10].mxu1 %v1253_v5 }
 0x24b   : > { %2255 = vmatprep.mubr.f32.mxu1 %v1223_v50 }
 0x24e   : > { %2256 = vmatmul.mubr.f32.vlgmr.msra.gmra.mrb[8].mxu1 %v1233_v55 }
 0x24f   : > { %2258 = vmatprep.mubr.f32.mxu1 %v1243_v61 }
 0x252   : > { %2259 = vmatmul.mubr.f32.gmra.mrb[10].mxu1 %v1253_v5 }
 0x321   : > { %v2257_v13 = vpop.f32.mrb[8].mxu1 }
 0x322   : > { %1776 = vxpose.xlu1.b32.start.end [1/1] (short) (narrow) %v2257_v13, 8  ;;  %v1722_v9 = vpop.f32.mrb[9].mxu1 }
 0x323   : > { %1744 = vxpose.xlu0.b32.start.end [1/1] (short) (narrow) %v1722_v9, 8 }
 0x325   : > { %v2260_v14 = vpop.f32.mrb[10].mxu1 }
 0x326   : > { %1840 = vxpose.xlu1.b32.start.end [1/1] (short) (narrow) %v2260_v14, 8  ;;  %v1734_v15 = vpop.f32.mrb[11].mxu1 }
 0x327   : > { %1808 = vxpose.xlu0.b32.start.end [1/1] (short) (narrow) %v1734_v15, 8 }
 0x3a2   : > { %v1792_v16 = vpop.trf.xlu1 }
 0x3a3   : > { %v1873_v17 = vmul.f32 0.11111111, %v1792_v16  ;;  %v1760_v18 = vpop.trf.xlu0 }
 0x3a4   : > { %v1872_v19 = vmul.f32 0.11111111, %v1760_v18 }
 0x3a5   : > { %1878 = vst.msk [vmem:[%s216_s22 + $0x8] sm:$0xff] %vm1876_vm1, %v1873_v17 }
 0x3a6   : > { %1877 = vst.msk [vmem:[%s216_s22] sm:$0xff] %vm1876_vm1, %v1872_v19  ;;  %v1856_v20 = vpop.trf.xlu1 }
 0x3a7   : > { %v1875_v21 = vmul.f32 0.11111111, %v1856_v20  ;;  %v1824_v22 = vpop.trf.xlu0 }
 0x3a8   : > { %v1874_v23 = vmul.f32 0.11111111, %v1824_v22 }
 0x3a9   : > { %1880 = vst.msk [vmem:[%s216_s22 + $0x18] sm:$0xff] %vm1876_vm1, %v1875_v21 }
 0x3aa   : > { %1879 = vst.msk [vmem:[%s216_s22 + $0x10] sm:$0xff] %vm1876_vm1, %v1874_v23 }
 0x3ab   : > { %2542 = shalt.err (!%p2539_p12)
}
 0x3ac   : > { %s2543_s10 = scalar_lea.hbm %s2961_s6, 512  ;;  %s2547_s26 = scalar_lea.hbm %s3010_s3, 1024 }
 0x3ad   : > { %p2544_p3 = scmp.ne.s32.totalorder %s2961_s6, %s2543_s10  ;;  %p2548_p7 = scmp.lt.u32.totalorder %s2961_s6, %s3010_s3 }
 0x3ae   : > { %p2549_p9 = scmp.lt.u32.totalorder %s2547_s26, %s2543_s10  ;;  %p2551_p10 = scmp.lt.u32.totalorder %s2543_s10, %s2961_s6 }
 0x3af   : > { %p2545_p6 = pnand %p2544_p3, %p3032_p1 }
 0x3b0   : > { %p2550_p8 = por %p2549_p9, %p2548_p7 }
 0x3b1   : > { %p2546_p13 = pneg %p2545_p6 }
 0x3b2   : > { %p2552_p4 = por %p2551_p10, %p2550_p8 }
 0x3b4   : > { %p2553_p0 = pnand %p2552_p4, %p2546_p13 }
 0x3b6   : > { %2556 = shalt.err (!%p2553_p0)
}
 0x3b7   : > { %s2611_s23 = smov 128   ;;  %s2612_s22 = smov 8  }
 0x3b8   : > { %2381 = dma.vmem_to_hbm [thread:$0]  (%p3032_p1), %s2955_s11, 512, %s2961_s6, %s1882_s16, %s2611_s23, %s2611_s23, %s2612_s22  }
 0x3b9 PF: > { %s1910_s4 = sand.u32 1, %s2591_s12   ;;  %p3033_p2 = scmp.ne.s32.totalorder %s3019_s25, 0 }
 0x3ba   : > { %p3034_p5 = scmp.ge.s32.totalorder %s2603_s15, 2  ;;  %s1911_s17 = scalar_lea.sflag [#allocation4], %s1910_s4 }
 0x3bc   : > { %p2395_p11 = pnand %p3034_p5, %p3033_p2 }
 0x3be   : > { %2586 = dma.done.wait (!%p2395_p11), %s1911_s17, 512  }
 0x3bf   : > { %2588 = vsyncadd (!%p2395_p11), %s1911_s17, 4294966784  ;;  %p15_p12 = scmp.ge.s32.totalorder %s2658_s18, 4   ;;  %s3035_s12 = smov %s2595_s13 }
 0x3c0   : > { %s3036_s13 = smov %s2599_s14  ;;  %s3037_s14 = smov %s2670_s21 }
 0x3c1   : > { %s3038_s15 = smov %s2658_s18  ;;  %17 = sbr.rel (!%p15_p12) target bundleno = 5 (0x5), region = 84 }
 0x3c8   :  { %1916 = vsyncpa [#allocation3], 1 }
 0x3c9   :  { %1918 = vsyncpa [#allocation3 + $0x1], 1 }
 0x3ca   :  { %1919 = vsyncpa [#allocation6], 1 }
 0x3cb   :  { %1920 = vsyncpa [#allocation4], 1 }
 0x3cc   :  { %1922 = vsyncpa [#allocation4 + $0x1], 1 }

</bundles_post_ra>
